<compile_context>
chip_gen: v7x
topology: tpu7x:2x2x1
jax: 0.10.0
libtpu: 0.0.40
codegen_flags: <defaults>
</compile_context>

<pallas_src>
import math

import jax
import jax.numpy as jnp
from jax import lax
from jax.experimental import pallas as pl
from jax.experimental.pallas import tpu as pltpu

_EPS = 1e-5
_LANES = 128


# ----------------------------- kernels ------------------------------------- #

def _rowwise_kernel(x_ref, w_ref, o_ref):
    """General path: per-row normalization over the full (lane) extent D."""
    x = x_ref[...].astype(jnp.float32)                                  # (TB, D)
    w = w_ref[...].astype(jnp.float32)                                  # (1, D)
    mean = jnp.mean(x, axis=-1, keepdims=True)
    var = jnp.mean(jnp.square(x - mean), axis=-1, keepdims=True)        # unbiased=False
    inv = lax.rsqrt(var + jnp.float32(_EPS))                            # EUP rsqrt
    o_ref[...] = (x * inv * w).astype(o_ref.dtype)


def _make_packed_kernel(d: int):
    """Lane-packed path: k = 128 // d original rows live in one 128-lane row."""
    inv_d = 1.0 / d

    def kernel(x_ref, w_ref, seg_ref, o_ref):
        x = x_ref[...].astype(jnp.float32)                              # (TB, 128)
        w = w_ref[...].astype(jnp.float32)                              # (1, 128) weight tiled k times
        B = seg_ref[...]                                                # (128, 128) block-diag ones, f32
        # Segmented sums (per original row) broadcast back to every lane, on the MXU
        # (free at the HBM roofline). Two-pass form keeps torch.var(unbiased=False)
        # numerics without E[x^2]-E[x]^2 cancellation.
        mean = jnp.dot(x, B, preferred_element_type=jnp.float32) * inv_d
        dev = x - mean
        var = jnp.dot(dev * dev, B, preferred_element_type=jnp.float32) * inv_d
        inv = lax.rsqrt(var + jnp.float32(_EPS))
        o_ref[...] = (x * inv * w).astype(o_ref.dtype)

    return kernel


# ----------------------------- tiling helpers ------------------------------- #

def _vmem_capacity_bytes() -> int:
    try:
        info = pltpu.get_tpu_info()
        cap = int(getattr(info, "vmem_capacity_bytes", 0))
        if cap > 0:
            return cap
    except Exception:
        pass
    return 64 * 1024 * 1024  # conservative: assume v7x (smallest VMEM)


def _choose_tile(n_rows: int, row_elems: int, in_itemsize: int, capacity: int):
    """Pick the row tile (multiple of 8) and an explicit scoped-VMEM budget."""
    row_in_bytes = row_elems * in_itemsize
    row_f32_bytes = row_elems * 4
    cap_limit = capacity * 3 // 4                       # headroom below physical VMEM
    # Bigger tiles amortize the ~0.35us/step grid overhead; v5e/v6e (128 MiB VMEM)
    # get 8 MiB tiles, v7x (64 MiB) gets 4 MiB.
    budget = (8 << 20) if capacity >= (100 << 20) else (4 << 20)

    def vmem_need(rows):
        # double-buffered in + out tiles, plus f32 intermediates (upcast, dev, dev^2, ...)
        return 4 * rows * row_in_bytes + 5 * rows * row_f32_bytes + (2 << 20)

    tb = max(8, (budget // max(row_in_bytes, 1)) // 8 * 8)
    while tb > 8 and vmem_need(tb) > cap_limit:
        tb = max(8, (tb // 2) // 8 * 8)

    if n_rows <= tb:
        if n_rows >= 16 and n_rows * row_in_bytes >= (1 << 20):
            # Large enough to be HBM-bound: keep >= 2 grid steps so both v7x
            # TensorCores stream (no effect on single-TC v5e/v6e).
            tb = ((n_rows + 1) // 2 + 7) // 8 * 8
        else:
            tb = n_rows
    vmem_limit = int(min(max(vmem_need(max(tb, 8)), 32 << 20), cap_limit))
    return tb, vmem_limit


# ----------------------------- wrapper -------------------------------------- #

def bias_free_layer_norm(x: jax.Array, weight: jax.Array) -> jax.Array:
    """x: (..., D); weight: (D,). Returns x / sqrt(var(x, -1, ddof=0) + 1e-5) * weight."""
    D = x.shape[-1]
    assert weight.shape == (D,), (weight.shape, D)

    orig_shape = x.shape
    N = max(1, math.prod(orig_shape[:-1]))
    x2 = x.reshape(N, D)

    capacity = _vmem_capacity_bytes()
    itemsize = jnp.dtype(x.dtype).itemsize

    if D < _LANES and _LANES % D == 0:
        # ---- lane-dense packed path (narrow D) ----
        k = _LANES // D
        n_rows = ((N + k - 1) // k + 7) // 8 * 8          # packed rows, multiple of 8
        pad = n_rows * k - N
        if pad:
            x2 = jnp.pad(x2, ((0, pad), (0, 0)))          # zero rows; sliced off below
        xp = x2.reshape(n_rows, _LANES)
        wp = jnp.tile(weight.reshape(1, D), (1, k))       # (1, 128)
        seg = jnp.arange(_LANES) // D
        seg_mat = (seg[:, None] == seg[None, :]).astype(jnp.float32)   # block-diag ones

        tb, vmem_limit = _choose_tile(n_rows, _LANES, itemsize, capacity)
        grid = (pl.cdiv(n_rows, tb),)
        cost = pl.CostEstimate(
            flops=8 * N * D + 2 * n_rows * _LANES * _LANES,
            transcendentals=N,
            bytes_accessed=2 * N * D * itemsize + _LANES * jnp.dtype(weight.dtype).itemsize,
        )
        out = pl.pallas_call(
            _make_packed_kernel(D),
            out_shape=jax.ShapeDtypeStruct((n_rows, _LANES), x.dtype),
            grid_spec=pltpu.PrefetchScalarGridSpec(
                num_scalar_prefetch=0,
                grid=grid,
                in_specs=[
                    pl.BlockSpec((tb, _LANES), lambda i: (i, 0)),        # packed x tile
                    pl.BlockSpec((1, _LANES), lambda i: (0, 0)),         # tiled weight, resident
                    pl.BlockSpec((_LANES, _LANES), lambda i: (0, 0)),    # block-ones, resident
                ],
                out_specs=pl.BlockSpec((tb, _LANES), lambda i: (i, 0)),
            ),
            compiler_params=pltpu.CompilerParams(
                dimension_semantics=("parallel",),
                vmem_limit_bytes=vmem_limit,
            ),
            cost_estimate=cost,
        )(xp, wp, seg_mat)
        out = out.reshape(n_rows * k, D)[:N]
        return out.reshape(orig_shape)

    # ---- general row-wise path (D >= 128, or D not a divisor of 128) ----
    # TODO(synk): for D that is not a multiple of 128 the store is still a masked
    # vst.msk; in production prefer fusing this op into its consumer.
    w2 = weight.reshape(1, D)
    tb, vmem_limit = _choose_tile(N, D, itemsize, capacity)
    grid = (pl.cdiv(N, tb),)
    cost = pl.CostEstimate(
        flops=8 * N * D,
        transcendentals=N,
        bytes_accessed=2 * N * D * itemsize + D * jnp.dtype(weight.dtype).itemsize,
    )
    out2 = pl.pallas_call(
        _rowwise_kernel,
        out_shape=jax.ShapeDtypeStruct((N, D), x.dtype),
        grid_spec=pltpu.PrefetchScalarGridSpec(
            num_scalar_prefetch=0,
            grid=grid,
            in_specs=[
                pl.BlockSpec((tb, D), lambda i: (i, 0)),
                pl.BlockSpec((1, D), lambda i: (0, 0)),
            ],
            out_specs=pl.BlockSpec((tb, D), lambda i: (i, 0)),
        ),
        compiler_params=pltpu.CompilerParams(
            dimension_semantics=("parallel",),
            vmem_limit_bytes=vmem_limit,
        ),
        cost_estimate=cost,
    )(x2, w2)
    return out2.reshape(orig_shape)


# ----------------------------- reference & test ----------------------------- #

def _reference(x: jax.Array, weight: jax.Array) -> jax.Array:
    xf = x.astype(jnp.float32)
    var = jnp.var(xf, axis=-1, keepdims=True)             # ddof=0 == unbiased=False
    return (xf / jnp.sqrt(var + 1e-5) * weight.astype(jnp.float32)).astype(x.dtype)


if __name__ == "__main__":
    key = jax.random.PRNGKey(0)
    kx, kw, kx2, kw2 = jax.random.split(key, 4)

    # Case 1: narrow hidden dim (D=32) -> lane-packed path. batch=2, seq=8, hidden=32.
    B, S, D = 2, 8, 32
    x = jax.random.normal(kx, (B, S, D), dtype=jnp.float32) * 2.0 + 0.5
    w = jnp.ones((D,), jnp.float32) + 0.1 * jax.random.normal(kw, (D,), jnp.float32)
    out = jax.block_until_ready(bias_free_layer_norm(x, w))
    ref = _reference(x, w)
    assert out.shape == (B, S, D), out.shape
    assert jnp.allclose(out, ref, atol=1e-4, rtol=1e-4), (
        f"packed-path mismatch: max abs diff {float(jnp.max(jnp.abs(out - ref)))}"
    )

    # Case 2: wide hidden dim (D=256) -> general row-wise path.
    B2, S2, D2 = 2, 8, 256
    x2 = jax.random.normal(kx2, (B2, S2, D2), dtype=jnp.float32)
    w2 = jnp.ones((D2,), jnp.float32) + 0.05 * jax.random.normal(kw2, (D2,), jnp.float32)
    out2 = jax.block_until_ready(bias_free_layer_norm(x2, w2))
    ref2 = _reference(x2, w2)
    assert out2.shape == (B2, S2, D2), out2.shape
    assert jnp.allclose(out2, ref2, atol=1e-4, rtol=1e-4), (
        f"rowwise-path mismatch: max abs diff {float(jnp.max(jnp.abs(out2 - ref2)))}"
    )

    print("KERNEL_OK")
</pallas_src>

<mosaic_0001>
module attributes {stable_mosaic.version = 11 : i64} {
  func.func @kernel(%arg0: i32, %arg1: memref<8x128xf32, #tpu.memory_space<vmem>>, %arg2: memref<1x128xf32, #tpu.memory_space<vmem>>, %arg3: memref<128x128xf32, #tpu.memory_space<vmem>>, %arg4: memref<8x128xf32, #tpu.memory_space<vmem>>) attributes {dimension_semantics = [#tpu.dimension_semantics<parallel>], iteration_bounds = array<i64: 1>, scalar_prefetch = 0 : i64, scratch_operands = 0 : i64, tpu.core_type = #tpu.core_type<tc>, window_params = [{transform_indices = @transform_0, window_bounds = array<i64: 8, 128>}, {pipeline_mode = #tpu.pipeline_mode<synchronous>, transform_indices = @transform_1, window_bounds = array<i64: 1, 128>}, {pipeline_mode = #tpu.pipeline_mode<synchronous>, transform_indices = @transform_2, window_bounds = array<i64: 128, 128>}, {transform_indices = @transform_3, window_bounds = array<i64: 8, 128>}]} {
    %c0 = arith.constant 0 : index
    %c0_0 = arith.constant 0 : index
    %0 = vector.load %arg1[%c0, %c0_0] : memref<8x128xf32, #tpu.memory_space<vmem>>, vector<8x128xf32>
    %c0_1 = arith.constant 0 : index
    %c0_2 = arith.constant 0 : index
    %1 = vector.load %arg2[%c0_1, %c0_2] : memref<1x128xf32, #tpu.memory_space<vmem>>, vector<1x128xf32>
    %c0_3 = arith.constant 0 : index
    %c0_4 = arith.constant 0 : index
    %2 = vector.load %arg3[%c0_3, %c0_4] : memref<128x128xf32, #tpu.memory_space<vmem>>, vector<128x128xf32>
    %cst = arith.constant dense<0.000000e+00> : vector<8x128xf32>
    %3 = tpu.matmul %0, %2, %cst {dimension_numbers = #tpu.dot_dimension_numbers<[1], [0], [0], [1], [0, 0, 1, 1], [], []>} : vector<8x128xf32>, vector<128x128xf32>, vector<8x128xf32> -> vector<8x128xf32>
    %cst_5 = arith.constant 3.125000e-02 : f32
    %4 = vector.broadcast %cst_5 : f32 to vector<8x128xf32>
    %5 = arith.mulf %3, %4 : vector<8x128xf32>
    %6 = arith.subf %0, %5 : vector<8x128xf32>
    %7 = arith.mulf %6, %6 : vector<8x128xf32>
    %cst_6 = arith.constant dense<0.000000e+00> : vector<8x128xf32>
    %8 = tpu.matmul %7, %2, %cst_6 {dimension_numbers = #tpu.dot_dimension_numbers<[1], [0], [0], [1], [0, 0, 1, 1], [], []>} : vector<8x128xf32>, vector<128x128xf32>, vector<8x128xf32> -> vector<8x128xf32>
    %cst_7 = arith.constant 3.125000e-02 : f32
    %9 = vector.broadcast %cst_7 : f32 to vector<8x128xf32>
    %10 = arith.mulf %8, %9 : vector<8x128xf32>
    %cst_8 = arith.constant 9.99999974E-6 : f32
    %11 = vector.broadcast %cst_8 : f32 to vector<8x128xf32>
    %12 = arith.addf %10, %11 : vector<8x128xf32>
    %13 = math.rsqrt %12 : vector<8x128xf32>
    %14 = arith.mulf %0, %13 : vector<8x128xf32>
    %15 = vector.broadcast %1 : vector<1x128xf32> to vector<8x128xf32>
    %16 = arith.mulf %14, %15 : vector<8x128xf32>
    %c0_9 = arith.constant 0 : index
    %c0_10 = arith.constant 0 : index
    %17 = vector.load %arg4[%c0_9, %c0_10] : memref<8x128xf32, #tpu.memory_space<vmem>>, vector<8x128xf32>
    tpu.vector_store %arg4[%c0_9, %c0_10], %16 {strides = array<i32>} : memref<8x128xf32, #tpu.memory_space<vmem>>, vector<8x128xf32>,
    return
  }
  func.func @transform_0(%arg0: i32) -> (i32, i32) {
    %c0_i32 = arith.constant 0 : i32
    %c0_i32_0 = arith.constant 0 : i32
    return %arg0, %c0_i32 : i32, i32
  }
  func.func @transform_1(%arg0: i32) -> (i32, i32) {
    %c0_i32 = arith.constant 0 : i32
    %c0_i32_0 = arith.constant 0 : i32
    %c0_i32_1 = arith.constant 0 : i32
    return %c0_i32, %c0_i32_0 : i32, i32
  }
  func.func @transform_2(%arg0: i32) -> (i32, i32) {
    %c0_i32 = arith.constant 0 : i32
    %c0_i32_0 = arith.constant 0 : i32
    %c0_i32_1 = arith.constant 0 : i32
    return %c0_i32, %c0_i32_0 : i32, i32
  }
  func.func @transform_3(%arg0: i32) -> (i32, i32) {
    %c0_i32 = arith.constant 0 : i32
    %c0_i32_0 = arith.constant 0 : i32
    return %arg0, %c0_i32 : i32, i32
  }
}

</mosaic_0001>

<bundles_post_ra>
// kernel: tpu_custom_call.1
= control target key start
LH: loop header
LB: loop body
LE: loop exit
PB: predicated region body
PF: predicated region fallthrough
CT: control target
= control target key end

     0   :  { %8 = vsyncpa [#allocation3], 0  ;;  %s539_s0 = inlined_call_operand.hbm [shape: f32[8,128], index: 0, kind: input, shape index: {}]   ;;  %s540_s1 = inlined_call_operand.vmem [shape: f32[1,128], index: 1, kind: input, shape index: {}]   ;;  %s541_s2 = inlined_call_operand.hbm [shape: f32[128,128], index: 2, kind: input, shape index: {}]   ;;  %s542_s3 = inlined_call_operand.hbm [shape: f32[8,128], index: 3, kind: output, shape index: {}]  }
   0x1   :  { %9 = vsyncpa [#allocation6], 0 }
   0x2   :  { %10 = vsyncpa [#allocation4], 0  ;;  %s465_s12 = smov [#allocation2]   ;;  %s466_s14 = smov [#allocation5]  }
   0x3   :  { %s17_s13 = sshll.u32 %s465_s12, 4  ;;  %s28_s15 = sshll.u32 %s466_s14, 4  ;;  %s18_s13 = int_to_ptr.vmem [resolvable:$true] %s17_s13  ;;  %s493_s15 = int_to_ptr.vmem [resolvable:$true] %s28_s15 }
   0x4   :  { %s393_s18 = scalar_lea.hbm %s539_s0, 128 }
   0x5   :  { %p394_p0 = scmp.ne.s32.totalorder %s539_s0, %s393_s18  ;;  %p397_p1 = scmp.lt.u32.totalorder %s393_s18, %s539_s0 }
   0x7   :  { %p399_p2 = pnand %p397_p1, %p394_p0 }
   0x9   :  { %402 = shalt.err (!%p399_p2)
}
   0xa   :  { %s403_s23 = scalar_lea.vmem %s18_s13, 128  ;;  %p408_p4 = scmp.lt.s32.totalorder %s18_s13, %s18_s13 }
   0xb   :  { %p404_p3 = scmp.ne.s32.totalorder %s18_s13, %s403_s23  ;;  %p409_p5 = scmp.lt.s32.totalorder %s403_s23, %s403_s23 }
   0xd   :  { %p410_p6 = por %p409_p5, %p408_p4 }
   0xf   :  { %p411_p7 = pnand %p410_p6, %p404_p3 }
  0x11   :  { %414 = shalt.err (!%p411_p7)
}
  0x12   :  { %20 = dma.hbm_to_vmem [thread:$0]  %s539_s0, 128, %s18_s13, [#allocation3]  }
  0x13   :  { %s415_s28 = scalar_lea.hbm %s541_s2, 2048 }
  0x14   :  { %p416_p8 = scmp.ne.s32.totalorder %s541_s2, %s415_s28  ;;  %p419_p9 = scmp.lt.u32.totalorder %s415_s28, %s541_s2 }
  0x16   :  { %p421_p10 = pnand %p419_p9, %p416_p8 }
  0x18   :  { %424 = shalt.err (!%p421_p10)
}
  0x19   :  { %s425_s6 = scalar_lea.vmem %s493_s15, 2048  ;;  %p430_p12 = scmp.lt.s32.totalorder %s493_s15, %s493_s15 }
  0x1a   :  { %p426_p11 = scmp.ne.s32.totalorder %s493_s15, %s425_s6  ;;  %p431_p13 = scmp.lt.s32.totalorder %s425_s6, %s425_s6 }
  0x1c   :  { %p432_p0 = por %p431_p13, %p430_p12 }
  0x1e   :  { %p433_p1 = pnand %p432_p0, %p426_p11 }
  0x20   :  { %436 = shalt.err (!%p433_p1)
}
  0x21   :  { %s467_s0 = smov 128   ;;  %s468_s7 = smov 8  }
  0x22   :  { %34 = dma.hbm_to_vmem [thread:$0]  %s541_s2, 2048, %s493_s15, [#allocation6], %s467_s0, %s467_s0, %s468_s7  }
  0x23   :  { %459 = dma.done.wait [#allocation3], 128  }
  0x24   :  { %460 = vsyncadd [#allocation3], 4294967168 }
  0x25   :  { %461 = dma.done.wait [#allocation6], 2048  }
  0x26   :  { %462 = vsyncadd [#allocation6], 4294965248  ;;  %v469_v0 = vmov 0.0|0.0   ;;  %vm470_vm0 = vmmov 0   ;;  %v471_v1 = vmov 0.0   ;;  %v43_v2 = vld [vmem:[#allocation5] sm:$0xff] }
  0x27   :  { %335 = vmatprep.subr.bf16.mxu0 %v469_v0  ;;  %297 = vmatprep.mubr.msk.f32.mxu0 %vm470_vm0, %v471_v1  ;;  %v44_v3 = vld [vmem:[#allocation5 + $0x8] sm:$0xff]  ;;  %v45_v4 = vld [vmem:[#allocation5 + $0x10] sm:$0xff]  ;;  %v46_v6 = vld [vmem:[#allocation5 + $0x18] sm:$0xff]  ;;  %s472_s11 = smov [#allocation7]  }
  0x28   :  { %359 = vmatprep.subr.bf16.mxu1 %v469_v0  ;;  %332 = vmatprep.mubr.msk.f32.mxu1 %vm470_vm0, %v471_v1  ;;  %v336_v5 = vpack.c.bf16 %v44_v3, %v43_v2  ;;  %v339_v7 = vpack.c.bf16 %v46_v6, %v45_v4  ;;  %v47_v8 = vld [vmem:[#allocation5 + $0x20] sm:$0xff]  ;;  %v48_v9 = vld [vmem:[#allocation5 + $0x28] sm:$0xff]  ;;  %v49_v11 = vld [vmem:[#allocation5 + $0x30] sm:$0xff]  ;;  %s220_s12 = sshll.u32 %s472_s11, 4  ;;  %s221_s12 = int_to_ptr.vmem [resolvable:$true] %s220_s12 }
  0x29   :  { %v342_v10 = vpack.c.bf16 %v48_v9, %v47_v8  ;;  %v50_v12 = vld [vmem:[#allocation5 + $0x38] sm:$0xff]  ;;  %v51_v14 = vld [vmem:[#allocation5 + $0x40] sm:$0xff]  ;;  %v52_v15 = vld [vmem:[#allocation5 + $0x48] sm:$0xff]  ;;  %s437_s13 = scalar_lea.vmem %s221_s12, 128  ;;  %p442_p3 = scmp.lt.s32.totalorder %s221_s12, %s221_s12 }
  0x2a   :  { %337 = vmatpush3.bf16.msra.mxu0 %v336_v5  ;;  %361 = vmatpush3.bf16.msra.mxu1 %v336_v5  ;;  %v345_v13 = vpack.c.bf16 %v50_v12, %v49_v11  ;;  %v348_v16 = vpack.c.bf16 %v52_v15, %v51_v14  ;;  %v53_v17 = vld [vmem:[#allocation5 + $0x50] sm:$0xff]  ;;  %v54_v18 = vld [vmem:[#allocation5 + $0x58] sm:$0xff]  ;;  %v55_v20 = vld [vmem:[#allocation5 + $0x60] sm:$0xff]  ;;  %p438_p2 = scmp.ne.s32.totalorder %s221_s12, %s437_s13  ;;  %p443_p4 = scmp.lt.s32.totalorder %s437_s13, %s437_s13 }
  0x2b   :  { %338 = vmatprep.subr.bf16.mxu0 %v469_v0  ;;  %362 = vmatprep.subr.bf16.mxu1 %v469_v0  ;;  %v351_v19 = vpack.c.bf16 %v54_v18, %v53_v17  ;;  %v56_v21 = vld [vmem:[#allocation5 + $0x68] sm:$0xff]  ;;  %v57_v23 = vld [vmem:[#allocation5 + $0x70] sm:$0xff]  ;;  %v58_v24 = vld [vmem:[#allocation5 + $0x78] sm:$0xff] }
  0x2c   :  { %v354_v22 = vpack.c.bf16 %v56_v21, %v55_v20  ;;  %v357_v25 = vpack.c.bf16 %v58_v24, %v57_v23  ;;  %v41_v26 = vld [vmem:[#allocation2] sm:$0xff]  ;;  %p444_p5 = por %p443_p4, %p442_p3 }
  0x2d   :  { %v230_v37 = vld [vmem:[%s540_s1] ss:$0 sm:$0xff] }
  0x2e   :  { %340 = vmatpush3.bf16.msra.mxu0 %v339_v7  ;;  %364 = vmatpush3.bf16.msra.mxu1 %v339_v7  ;;  %p445_p6 = pnand %p444_p5, %p438_p2 }
  0x2f   :  { %341 = vmatprep.subr.bf16.mxu0 %v469_v0  ;;  %365 = vmatprep.subr.bf16.mxu1 %v469_v0 }
  0x32   :  { %343 = vmatpush3.bf16.msra.mxu0 %v342_v10  ;;  %367 = vmatpush3.bf16.msra.mxu1 %v342_v10 }
  0x33   :  { %344 = vmatprep.subr.bf16.mxu0 %v469_v0  ;;  %368 = vmatprep.subr.bf16.mxu1 %v469_v0 }
  0x36   :  { %346 = vmatpush3.bf16.msra.mxu0 %v345_v13  ;;  %370 = vmatpush3.bf16.msra.mxu1 %v345_v13 }
  0x37   :  { %347 = vmatprep.subr.bf16.mxu0 %v469_v0  ;;  %371 = vmatprep.subr.bf16.mxu1 %v469_v0 }
  0x3a   :  { %349 = vmatpush3.bf16.msra.mxu0 %v348_v16  ;;  %373 = vmatpush3.bf16.msra.mxu1 %v348_v16 }
  0x3b   :  { %350 = vmatprep.subr.bf16.mxu0 %v469_v0  ;;  %374 = vmatprep.subr.bf16.mxu1 %v469_v0 }
  0x3e   :  { %352 = vmatpush3.bf16.msra.mxu0 %v351_v19  ;;  %376 = vmatpush3.bf16.msra.mxu1 %v351_v19 }
  0x3f   :  { %353 = vmatprep.subr.bf16.mxu0 %v469_v0  ;;  %377 = vmatprep.subr.bf16.mxu1 %v469_v0 }
  0x42   :  { %355 = vmatpush3.bf16.msra.mxu0 %v354_v22  ;;  %379 = vmatpush3.bf16.msra.mxu1 %v354_v22 }
  0x43   :  { %356 = vmatprep.subr.bf16.mxu0 %v469_v0  ;;  %380 = vmatprep.subr.bf16.mxu1 %v469_v0 }
  0x46   :  { %358 = vmatpush3.bf16.msra.mxu0 %v357_v25  ;;  %382 = vmatpush3.bf16.msra.mxu1 %v357_v25 }
  0x49   :  { %298 = vmatmul.mubr.f32.vlgmr.msra.gmra.mrb[0].mxu0 %v41_v26 }
 0x11c   :  { %v125_v27 = vpop.f32.mrb[0].mxu0 }
 0x11d   :  { %v129_v28 = vmul.f32 0.03125, %v125_v27  ;;  %v299_v29 = vpop.f32.mrb[1].mxu0 }
 0x11f   :  { %v130_v30 = vsub.f32 %v41_v26, %v129_v28 }
 0x121   :  { %v131_v31 = vmul.f32 %v130_v30, %v130_v30 }
 0x123   :  { %333 = vmatmul.mubr.f32.vlgmr.msra.gmra.mrb[0].mxu1 %v131_v31 }
 0x1f6   :  { %v198_v32 = vpop.f32.mrb[0].mxu1 }
 0x1f7   :  { %v202_v33 = vmul.f32 0.03125, %v198_v32  ;;  %v334_v34 = vpop.f32.mrb[1].mxu1 }
 0x1f9   :  { %v203_v35 = vadd.f32 1e-05, %v202_v33 }
 0x1fb   :  { %391 = vrsqrt.f32 %v203_v35 }
 0x205   :  { %v392_v36 = vpop.eup %391 }
 0x206   :  { %v205_v38 = vmul.f32 %v392_v36, %v41_v26 }
 0x208   :  { %v212_v39 = vmul.f32 %v230_v37, %v205_v38 }
 0x20a   :  { %213 = vst [vmem:[#allocation7] sm:$0xff] %v212_v39 }
 0x20b   :  { %448 = shalt.err (!%p445_p6)
}
 0x20c   :  { %s449_s16 = scalar_lea.hbm %s542_s3, 128 }
 0x20d   :  { %p450_p7 = scmp.ne.s32.totalorder %s542_s3, %s449_s16  ;;  %p453_p8 = scmp.lt.u32.totalorder %s449_s16, %s542_s3 }
 0x20f   :  { %p455_p9 = pnand %p453_p8, %p450_p7 }
 0x211   :  { %458 = shalt.err (!%p455_p9)
}
 0x212   :  { %223 = dma.vmem_to_hbm [thread:$0]  %s221_s12, 128, %s542_s3, [#allocation4]  }
 0x213   :  { %463 = dma.done.wait [#allocation4], 128  }
 0x214   :  { %464 = vsyncadd [#allocation4], 4294967168 }
 0x215   :  { %227 = vsyncpa [#allocation3], 1 }
 0x216   :  { %228 = vsyncpa [#allocation6], 1 }
 0x217   :  { %229 = vsyncpa [#allocation4], 1 }

</bundles_post_ra>
